<compile_context>
chip_gen: v5e
topology: v5e:2x2
jax: 0.10.0
libtpu: 0.0.40
codegen_flags: <defaults>
</compile_context>

<pallas_src>
import jax
import jax.numpy as jnp
from jax.experimental import pallas as pl
from jax.experimental.pallas import tpu as pltpu


def _round_up(n, m):
    return ((n + m - 1) // m) * m


def _dqn_kernel(x_ref, w1_ref, b1_ref, w2_ref, b2_ref, w3_ref, b3_ref, o_ref):
    """One batch tile of the fused MLP forward pass (bf16 MXU inputs, f32 accumulation)."""
    x = x_ref[...].astype(jnp.bfloat16)

    # fc1 + ReLU (bias add / ReLU in f32)
    h1 = jnp.dot(x, w1_ref[...], preferred_element_type=jnp.float32) + b1_ref[...]
    h1 = jnp.maximum(h1, 0.0).astype(jnp.bfloat16)

    # fc2 + ReLU
    h2 = jnp.dot(h1, w2_ref[...], preferred_element_type=jnp.float32) + b2_ref[...]
    h2 = jnp.maximum(h2, 0.0).astype(jnp.bfloat16)

    # fc3 (no activation), lane-dense (padded to 128) f32 store
    out = jnp.dot(h2, w3_ref[...], preferred_element_type=jnp.float32) + b3_ref[...]
    o_ref[...] = out


def dqn_forward(x, params, *, batch_tile=512):
    """x: (batch, input_dim) float32. params: dict w1,b1,w2,b2,w3,b3 (w*: (in,out), b*: (1,out))."""
    w1, b1 = params["w1"], params["b1"]
    w2, b2 = params["w2"], params["b2"]
    w3, b3 = params["w3"], params["b3"]

    batch, input_dim = x.shape
    output_dim = w3.shape[1]

    # Batch tile: multiple of 8 (f32 sublane); pad batch up to a whole number of tiles.
    tb = min(batch_tile, _round_up(batch, 8))
    tb = _round_up(tb, 8)
    batch_p = _round_up(batch, tb)
    if batch_p != batch:
        x = jnp.pad(x, ((0, batch_p - batch), (0, 0)))

    # Lane-dense output: pad output_dim up to a multiple of 128 with zero columns.
    nout = _round_up(output_dim, 128)
    if nout != output_dim:
        w3 = jnp.pad(w3, ((0, 0), (0, nout - output_dim)))
        b3 = jnp.pad(b3, ((0, 0), (0, nout - output_dim)))

    # bf16 weights (f32 accumulation happens inside the kernel); biases stay f32.
    w1 = w1.astype(jnp.bfloat16)
    w2 = w2.astype(jnp.bfloat16)
    w3 = w3.astype(jnp.bfloat16)

    grid = (pl.cdiv(batch_p, tb),)
    resident = lambda a: pl.BlockSpec(a.shape, lambda i: (0,) * a.ndim)  # DMA'd once, VMEM-resident

    out_padded = pl.pallas_call(
        _dqn_kernel,
        out_shape=jax.ShapeDtypeStruct((batch_p, nout), jnp.float32),
        grid=grid,
        in_specs=[
            pl.BlockSpec((tb, input_dim), lambda i: (i, 0)),  # x: tiled over batch
            resident(w1), resident(b1),
            resident(w2), resident(b2),
            resident(w3), resident(b3),
        ],
        out_specs=pl.BlockSpec((tb, nout), lambda i: (i, 0)),
        compiler_params=pltpu.CompilerParams(
            dimension_semantics=("parallel",),  # batch tiles are independent -> megacore split
        ),
    )(x, w1, b1, w2, b2, w3, b3)

    return out_padded[:batch, :output_dim]


def xavier_uniform(key, fan_in, fan_out, dtype=jnp.float32):
    """Matches torch.nn.init.xavier_uniform_: U(-a, a), a = sqrt(6 / (fan_in + fan_out))."""
    a = (6.0 / (fan_in + fan_out)) ** 0.5
    return jax.random.uniform(key, (fan_in, fan_out), dtype=dtype, minval=-a, maxval=a)


def init_dqn_params(key, input_dim, output_dim, hidden_dim=128):
    k1, k2, k3 = jax.random.split(key, 3)
    return {
        "w1": xavier_uniform(k1, input_dim, hidden_dim),
        "b1": jnp.zeros((1, hidden_dim), jnp.float32),
        "w2": xavier_uniform(k2, hidden_dim, hidden_dim),
        "b2": jnp.zeros((1, hidden_dim), jnp.float32),
        "w3": xavier_uniform(k3, hidden_dim, output_dim),
        "b3": jnp.zeros((1, output_dim), jnp.float32),
    }


def dqn_forward_ref_bf16(x, p):
    """Pure-JAX reference with identical numerics (bf16 MXU inputs, f32 accumulation)."""
    bf = jnp.bfloat16
    h1 = jnp.maximum(
        jnp.dot(x.astype(bf), p["w1"].astype(bf), preferred_element_type=jnp.float32) + p["b1"], 0.0)
    h2 = jnp.maximum(
        jnp.dot(h1.astype(bf), p["w2"].astype(bf), preferred_element_type=jnp.float32) + p["b2"], 0.0)
    return jnp.dot(h2.astype(bf), p["w3"].astype(bf), preferred_element_type=jnp.float32) + p["b3"]


def dqn_forward_ref_f32(x, p):
    """Full-precision reference (sanity check on bf16 quantization error)."""
    h1 = jnp.maximum(x @ p["w1"] + p["b1"], 0.0)
    h2 = jnp.maximum(h1 @ p["w2"] + p["b2"], 0.0)
    return h2 @ p["w3"] + p["b3"]


if __name__ == "__main__":
    key = jax.random.PRNGKey(0)
    k_param, k_x1, k_x2 = jax.random.split(key, 3)

    input_dim, output_dim, hidden_dim = 8, 4, 128
    params = init_dqn_params(k_param, input_dim, output_dim, hidden_dim)

    # Case 1: tiny serving-style batch (batch=2) -> single padded tile.
    x_small = jax.random.normal(k_x1, (2, input_dim), dtype=jnp.float32)
    q_small = jax.block_until_ready(dqn_forward(x_small, params))
    assert q_small.shape == (2, output_dim)
    assert jnp.allclose(q_small, dqn_forward_ref_bf16(x_small, params), atol=1e-4, rtol=1e-4)
    assert jnp.allclose(q_small, dqn_forward_ref_f32(x_small, params), atol=3e-2, rtol=3e-2)

    # Case 2: training-style batch with a multi-step pipelined grid (200 -> padded to 256, 4 tiles).
    x_big = jax.random.normal(k_x2, (200, input_dim), dtype=jnp.float32)
    q_big = jax.block_until_ready(dqn_forward(x_big, params, batch_tile=64))
    assert q_big.shape == (200, output_dim)
    assert jnp.allclose(q_big, dqn_forward_ref_bf16(x_big, params), atol=1e-4, rtol=1e-4)
    assert jnp.allclose(q_big, dqn_forward_ref_f32(x_big, params), atol=3e-2, rtol=3e-2)

    print("KERNEL_OK")
</pallas_src>

<mosaic_0001>
module attributes {stable_mosaic.version = 11 : i64} {
  func.func @_dqn_kernel(%arg0: i32, %arg1: memref<8x8xf32, #tpu.memory_space<vmem>>, %arg2: memref<8x128xbf16, #tpu.memory_space<vmem>>, %arg3: memref<1x128xf32, #tpu.memory_space<vmem>>, %arg4: memref<128x128xbf16, #tpu.memory_space<vmem>>, %arg5: memref<1x128xf32, #tpu.memory_space<vmem>>, %arg6: memref<128x128xbf16, #tpu.memory_space<vmem>>, %arg7: memref<1x128xf32, #tpu.memory_space<vmem>>, %arg8: memref<8x128xf32, #tpu.memory_space<vmem>>) attributes {dimension_semantics = [#tpu.dimension_semantics<parallel>], iteration_bounds = array<i64: 1>, scalar_prefetch = 0 : i64, scratch_operands = 0 : i64, tpu.core_type = #tpu.core_type<tc>, window_params = [{transform_indices = @transform_0, window_bounds = array<i64: 8, 8>}, {pipeline_mode = #tpu.pipeline_mode<synchronous>, transform_indices = @transform_1, window_bounds = array<i64: 8, 128>}, {pipeline_mode = #tpu.pipeline_mode<synchronous>, transform_indices = @transform_2, window_bounds = array<i64: 1, 128>}, {pipeline_mode = #tpu.pipeline_mode<synchronous>, transform_indices = @transform_3, window_bounds = array<i64: 128, 128>}, {pipeline_mode = #tpu.pipeline_mode<synchronous>, transform_indices = @transform_4, window_bounds = array<i64: 1, 128>}, {pipeline_mode = #tpu.pipeline_mode<synchronous>, transform_indices = @transform_5, window_bounds = array<i64: 128, 128>}, {pipeline_mode = #tpu.pipeline_mode<synchronous>, transform_indices = @transform_6, window_bounds = array<i64: 1, 128>}, {transform_indices = @transform_7, window_bounds = array<i64: 8, 128>}]} {
    %c0 = arith.constant 0 : index
    %c0_0 = arith.constant 0 : index
    %0 = vector.load %arg1[%c0, %c0_0] : memref<8x8xf32, #tpu.memory_space<vmem>>, vector<8x8xf32>
    %1 = arith.truncf %0 : vector<8x8xf32> to vector<8x8xbf16>
    %c0_1 = arith.constant 0 : index
    %c0_2 = arith.constant 0 : index
    %2 = vector.load %arg2[%c0_1, %c0_2] : memref<8x128xbf16, #tpu.memory_space<vmem>>, vector<8x128xbf16>
    %cst = arith.constant dense<0.000000e+00> : vector<8x128xf32>
    %3 = tpu.matmul %1, %2, %cst {dimension_numbers = #tpu.dot_dimension_numbers<[1], [0], [0], [1], [0, 0, 1, 1], [], []>} : vector<8x8xbf16>, vector<8x128xbf16>, vector<8x128xf32> -> vector<8x128xf32>
    %c0_3 = arith.constant 0 : index
    %c0_4 = arith.constant 0 : index
    %4 = vector.load %arg3[%c0_3, %c0_4] : memref<1x128xf32, #tpu.memory_space<vmem>>, vector<1x128xf32>
    %5 = vector.broadcast %4 : vector<1x128xf32> to vector<8x128xf32>
    %6 = arith.addf %3, %5 : vector<8x128xf32>
    %cst_5 = arith.constant 0.000000e+00 : f32
    %7 = vector.broadcast %cst_5 : f32 to vector<8x128xf32>
    %8 = arith.maximumf %6, %7 : vector<8x128xf32>
    %9 = arith.truncf %8 : vector<8x128xf32> to vector<8x128xbf16>
    %c0_6 = arith.constant 0 : index
    %c0_7 = arith.constant 0 : index
    %10 = vector.load %arg4[%c0_6, %c0_7] : memref<128x128xbf16, #tpu.memory_space<vmem>>, vector<128x128xbf16>
    %cst_8 = arith.constant dense<0.000000e+00> : vector<8x128xf32>
    %11 = tpu.matmul %9, %10, %cst_8 {dimension_numbers = #tpu.dot_dimension_numbers<[1], [0], [0], [1], [0, 0, 1, 1], [], []>} : vector<8x128xbf16>, vector<128x128xbf16>, vector<8x128xf32> -> vector<8x128xf32>
    %c0_9 = arith.constant 0 : index
    %c0_10 = arith.constant 0 : index
    %12 = vector.load %arg5[%c0_9, %c0_10] : memref<1x128xf32, #tpu.memory_space<vmem>>, vector<1x128xf32>
    %13 = vector.broadcast %12 : vector<1x128xf32> to vector<8x128xf32>
    %14 = arith.addf %11, %13 : vector<8x128xf32>
    %cst_11 = arith.constant 0.000000e+00 : f32
    %15 = vector.broadcast %cst_11 : f32 to vector<8x128xf32>
    %16 = arith.maximumf %14, %15 : vector<8x128xf32>
    %17 = arith.truncf %16 : vector<8x128xf32> to vector<8x128xbf16>
    %c0_12 = arith.constant 0 : index
    %c0_13 = arith.constant 0 : index
    %18 = vector.load %arg6[%c0_12, %c0_13] : memref<128x128xbf16, #tpu.memory_space<vmem>>, vector<128x128xbf16>
    %cst_14 = arith.constant dense<0.000000e+00> : vector<8x128xf32>
    %19 = tpu.matmul %17, %18, %cst_14 {dimension_numbers = #tpu.dot_dimension_numbers<[1], [0], [0], [1], [0, 0, 1, 1], [], []>} : vector<8x128xbf16>, vector<128x128xbf16>, vector<8x128xf32> -> vector<8x128xf32>
    %c0_15 = arith.constant 0 : index
    %c0_16 = arith.constant 0 : index
    %20 = vector.load %arg7[%c0_15, %c0_16] : memref<1x128xf32, #tpu.memory_space<vmem>>, vector<1x128xf32>
    %21 = vector.broadcast %20 : vector<1x128xf32> to vector<8x128xf32>
    %22 = arith.addf %19, %21 : vector<8x128xf32>
    %c0_17 = arith.constant 0 : index
    %c0_18 = arith.constant 0 : index
    %23 = vector.load %arg8[%c0_17, %c0_18] : memref<8x128xf32, #tpu.memory_space<vmem>>, vector<8x128xf32>
    tpu.vector_store %arg8[%c0_17, %c0_18], %22 {strides = array<i32>} : memref<8x128xf32, #tpu.memory_space<vmem>>, vector<8x128xf32>,
    return
  }
  func.func @transform_0(%arg0: i32) -> (i32, i32) {
    %c0_i32 = arith.constant 0 : i32
    %c0_i32_0 = arith.constant 0 : i32
    return %arg0, %c0_i32 : i32, i32
  }
  func.func @transform_1(%arg0: i32) -> (i32, i32) {
    %c0_i32 = arith.constant 0 : i32
    %c0_i32_0 = arith.constant 0 : i32
    %c0_i32_1 = arith.constant 0 : i32
    return %c0_i32, %c0_i32_0 : i32, i32
  }
  func.func @transform_2(%arg0: i32) -> (i32, i32) {
    %c0_i32 = arith.constant 0 : i32
    %c0_i32_0 = arith.constant 0 : i32
    %c0_i32_1 = arith.constant 0 : i32
    return %c0_i32, %c0_i32_0 : i32, i32
  }
  func.func @transform_3(%arg0: i32) -> (i32, i32) {
    %c0_i32 = arith.constant 0 : i32
    %c0_i32_0 = arith.constant 0 : i32
    %c0_i32_1 = arith.constant 0 : i32
    return %c0_i32, %c0_i32_0 : i32, i32
  }
  func.func @transform_4(%arg0: i32) -> (i32, i32) {
    %c0_i32 = arith.constant 0 : i32
    %c0_i32_0 = arith.constant 0 : i32
    %c0_i32_1 = arith.constant 0 : i32
    return %c0_i32, %c0_i32_0 : i32, i32
  }
  func.func @transform_5(%arg0: i32) -> (i32, i32) {
    %c0_i32 = arith.constant 0 : i32
    %c0_i32_0 = arith.constant 0 : i32
    %c0_i32_1 = arith.constant 0 : i32
    return %c0_i32, %c0_i32_0 : i32, i32
  }
  func.func @transform_6(%arg0: i32) -> (i32, i32) {
    %c0_i32 = arith.constant 0 : i32
    %c0_i32_0 = arith.constant 0 : i32
    %c0_i32_1 = arith.constant 0 : i32
    return %c0_i32, %c0_i32_0 : i32, i32
  }
  func.func @transform_7(%arg0: i32) -> (i32, i32) {
    %c0_i32 = arith.constant 0 : i32
    %c0_i32_0 = arith.constant 0 : i32
    return %arg0, %c0_i32 : i32, i32
  }
}

</mosaic_0001>

<bundles_post_ra>
// kernel: tpu_custom_call.1
= control target key start
LH: loop header
LB: loop body
LE: loop exit
PB: predicated region body
PF: predicated region fallthrough
CT: control target
= control target key end

     0   :  { %12 = vsyncpa [#allocation3], 0  ;;  %s591_s0 = inlined_call_operand.hbm [shape: f32[8,8], index: 0, kind: input, shape index: {}]   ;;  %s592_s1 = inlined_call_operand.hbm [shape: bf16[8,128], index: 1, kind: input, shape index: {}]   ;;  %s593_s2 = inlined_call_operand.vmem [shape: f32[1,128], index: 2, kind: input, shape index: {}]   ;;  %s594_s3 = inlined_call_operand.hbm [shape: bf16[128,128], index: 3, kind: input, shape index: {}]   ;;  %s595_s4 = inlined_call_operand.vmem [shape: f32[1,128], index: 4, kind: input, shape index: {}]   ;;  %s596_s5 = inlined_call_operand.hbm [shape: bf16[128,128], index: 5, kind: input, shape index: {}]   ;;  %s597_s6 = inlined_call_operand.vmem [shape: f32[1,128], index: 6, kind: input, shape index: {}]   ;;  %s598_s7 = inlined_call_operand.hbm [shape: f32[8,128], index: 7, kind: output, shape index: {}]  }
   0x1   :  { %13 = vsyncpa [#allocation6], 0 }
   0x2   :  { %14 = vsyncpa [#allocation9], 0  ;;  %s32_s26 = sshll.u32 %s592_s1, 4  ;;  %s33_s26 = int_to_ptr.hbm [resolvable:$true] %s32_s26 }
   0x3   :  { %15 = vsyncpa [#allocation4], 0  ;;  %s520_s27 = smov [#allocation5]   ;;  %s21_s8 = sshll.u32 %s591_s0, 4  ;;  %s22_s8 = int_to_ptr.hbm [resolvable:$true] %s21_s8 }
   0x4   :  { %s34_s28 = sshll.u32 %s520_s27, 4  ;;  %s521_s9 = smov [#allocation2]   ;;  %s35_s28 = int_to_ptr.vmem [resolvable:$true] %s34_s28 }
   0x5   :  { %37 = dma.hbm_to_vmem [thread:$0]  %s33_s26, 64, %s35_s28, [#allocation6]  }
   0x6   :  { %s23_s10 = sshll.u32 %s521_s9, 4  ;;  %s44_s13 = sshll.u32 %s594_s3, 4  ;;  %s24_s10 = int_to_ptr.vmem [resolvable:$true] %s23_s10  ;;  %s45_s13 = int_to_ptr.hbm [resolvable:$true] %s44_s13 }
   0x7   :  { %26 = dma.hbm_to_vmem [thread:$0]  %s22_s8, 128, %s24_s10, [#allocation3]  }
   0x8   :  { %s522_s1 = smov [#allocation7]   ;;  %s59_s17 = sshll.u32 %s596_s5, 4  ;;  %s60_s17 = int_to_ptr.hbm [resolvable:$true] %s59_s17 }
   0x9   :  { %s46_s14 = sshll.u32 %s522_s1, 4  ;;  %s523_s18 = smov 64   ;;  %s47_s14 = int_to_ptr.vmem [resolvable:$true] %s46_s14 }
   0xa   :  { %s524_s0 = smov 4   ;;  %s525_s19 = smov [#allocation8]  }
   0xb   :  { %52 = dma.hbm_to_vmem [thread:$0]  %s45_s13, 1024, %s47_s14, [#allocation6], %s523_s18, %s523_s18, %s524_s0  }
   0xc   :  { %s61_s20 = sshll.u32 %s525_s19, 4  ;;  %s62_s20 = int_to_ptr.vmem [resolvable:$true] %s61_s20 }
   0xd   :  { %67 = dma.hbm_to_vmem [thread:$0]  %s60_s17, 1024, %s62_s20, [#allocation9], %s523_s18, %s523_s18, %s524_s0  }
   0xe   :  { %512 = dma.done.wait [#allocation3], 128  }
   0xf   :  { %513 = vsyncadd [#allocation3], 4294967168 }
  0x10   :  { %514 = dma.done.wait [#allocation6], 1088  }
  0x11   :  { %515 = vsyncadd [#allocation6], 4294966208 }
  0x12   :  { %516 = dma.done.wait [#allocation9], 1024  }
  0x13   :  { %517 = vsyncadd [#allocation9], 4294966272  ;;  %vm98_vm0 = vcmask 1043456   ;;  %v89_v0 = vld [vmem:[#allocation5] sm:$0xf]  ;;  %v87_v1 = vld [vmem:[#allocation2] sm:$0xff] }
  0x14   :  { %v373_v2 = vld [vmem:[#allocation7 + $0x38] sm:$0xff]  ;;  %v100_v3 = vsel %vm98_vm0, %v89_v0, 0  ;;  %v88_v4 = vpack.c.bf16 %v87_v1, %v87_v1  ;;  %vm94_vm1 = vcmask 64512   ;;  %v372_v5 = vld [vmem:[#allocation7 + $0x30] sm:$0xff]  ;;  %v371_v6 = vld [vmem:[#allocation7 + $0x28] sm:$0xff]  ;;  %s526_s24 = smov [#allocation10]  }
  0x15   :  { %109 = vmatpush.bf16.msra.mxu0 %v100_v3  ;;  %185 = vmatpush.bf16.msra.mxu1 %v373_v2  ;;  %v370_v7 = vld [vmem:[#allocation7 + $0x20] sm:$0xff]  ;;  %v369_v8 = vld [vmem:[#allocation7 + $0x18] sm:$0xff]  ;;  %v368_v9 = vld [vmem:[#allocation7 + $0x10] sm:$0xff]  ;;  %s287_s25 = sshll.u32 %s526_s24, 4  ;;  %s289_s28 = sshll.u32 %s598_s7, 4  ;;  %s288_s25 = int_to_ptr.vmem [resolvable:$true] %s287_s25  ;;  %s290_s28 = int_to_ptr.hbm [resolvable:$true] %s289_s28 }
  0x16   :  { %v367_v10 = vld [vmem:[#allocation7 + $0x8] sm:$0xff]  ;;  %v366_v11 = vld [vmem:[#allocation7] sm:$0xff]  ;;  %v381_v12 = vld [vmem:[#allocation8 + $0x38] sm:$0xff] }
  0x17   :  { %268 = vmatpush.bf16.msra.mxu2 %v381_v12  ;;  %v380_v13 = vld [vmem:[#allocation8 + $0x30] sm:$0xff]  ;;  %v379_v14 = vld [vmem:[#allocation8 + $0x28] sm:$0xff]  ;;  %v378_v15 = vld [vmem:[#allocation8 + $0x20] sm:$0xff] }
  0x18   :  { %301 = vmatmul.msk.bf16.vlgmr.msra.gmra.mxu0 %vm94_vm1, %v88_v4  ;;  %v377_v16 = vld [vmem:[#allocation8 + $0x18] sm:$0xff]  ;;  %v376_v17 = vld [vmem:[#allocation8 + $0x10] sm:$0xff]  ;;  %v375_v24 = vld [vmem:[#allocation8 + $0x8] sm:$0xff] }
  0x19   :  { %186 = vmatpush.bf16.msra.mxu1 %v372_v5  ;;  %v389_v18 = vld [vmem:[%s593_s2] ss:$0 sm:$0xff]  ;;  %v374_v25 = vld [vmem:[#allocation8] sm:$0xff] }
  0x1a   :  { %v390_v26 = vld [vmem:[%s595_s4] ss:$0 sm:$0xff] }
  0x1b   :  { %269 = vmatpush.bf16.msra.mxu2 %v380_v13  ;;  %v391_v32 = vld [vmem:[%s597_s6] ss:$0 sm:$0xff] }
  0x1d   :  { %187 = vmatpush.bf16.msra.mxu1 %v371_v6 }
  0x1f   :  { %270 = vmatpush.bf16.msra.mxu2 %v379_v14 }
  0x21   :  { %188 = vmatpush.bf16.msra.mxu1 %v370_v7 }
  0x23   :  { %271 = vmatpush.bf16.msra.mxu2 %v378_v15 }
  0x25   :  { %189 = vmatpush.bf16.msra.mxu1 %v369_v8 }
  0x27   :  { %272 = vmatpush.bf16.msra.mxu2 %v377_v16 }
  0x29   :  { %190 = vmatpush.bf16.msra.mxu1 %v368_v9 }
  0x2b   :  { %273 = vmatpush.bf16.msra.mxu2 %v376_v17 }
  0x2d   :  { %191 = vmatpush.bf16.msra.mxu1 %v367_v10 }
  0x2f   :  { %274 = vmatpush.bf16.msra.mxu2 %v375_v24 }
  0x31   :  { %192 = vmatpush.bf16.msra.mxu1 %v366_v11 }
  0x33   :  { %275 = vmatpush.bf16.msra.mxu2 %v374_v25 }
  0x95   :  { %v111_v19 = vpop.f32.mrf.mxu0 }
  0x96   :  { %v112_v20 = vadd.f32 %v389_v18, %v111_v19 }
  0x98   :  { %v115_v21 = vmax.f32 %v112_v20, 0.0 }
  0x9a   :  { %v116_v22 = vpack.c.bf16 %v115_v21, %v115_v21 }
  0x9c   :  { %193 = vmatmul.bf16.vlgmr.msra.gmra.mxu1 %v116_v22 }
  0x9d   :  { %v113_v23 = vpop.f32.mrf.mxu0 }
 0x119   :  { %v194_v27 = vpop.f32.mrf.mxu1 }
 0x11a   :  { %v195_v28 = vadd.f32 %v390_v26, %v194_v27 }
 0x11c   :  { %v198_v29 = vmax.f32 %v195_v28, 0.0 }
 0x11e   :  { %v199_v30 = vpack.c.bf16 %v198_v29, %v198_v29 }
 0x120   :  { %276 = vmatmul.bf16.vlgmr.msra.gmra.mxu2 %v199_v30 }
 0x121   :  { %v196_v31 = vpop.f32.mrf.mxu1 }
 0x1a3   :  { %v277_v33 = vpop.f32.mrf.mxu2 }
 0x1a4   :  { %v278_v34 = vadd.f32 %v391_v32, %v277_v33 }
 0x1a6   :  { %281 = vst [vmem:[#allocation10] sm:$0xff] %v278_v34 }
 0x1a7   :  { %292 = dma.vmem_to_hbm [thread:$0]  %s288_s25, 128, %s290_s28, [#allocation4]  }
 0x1ab   :  { %v279_v35 = vpop.f32.mrf.mxu2 }
 0x1ac   :  { %518 = dma.done.wait [#allocation4], 128  }
 0x1ad   :  { %519 = vsyncadd [#allocation4], 4294967168 }
 0x1ae   :  { %297 = vsyncpa [#allocation3], 1 }
 0x1af   :  { %298 = vsyncpa [#allocation6], 1 }
 0x1b0   :  { %299 = vsyncpa [#allocation9], 1 }
 0x1b1   :  { %300 = vsyncpa [#allocation4], 1 }

</bundles_post_ra>
